<compile_context>
chip_gen: v7x
topology: tpu7x:2x2x1
jax: 0.10.0
libtpu: 0.0.40
codegen_flags: <defaults>
</compile_context>

<pallas_src>
import math

import jax
import jax.numpy as jnp
from jax.experimental import pallas as pl
from jax.experimental.pallas import tpu as pltpu


B_PAD = 8          # sublane rows per activation tile (also the per-tile batch capacity)
LANE = 128         # lane width / padded feature dimension


# ----------------------------------------------------------------------------
# Python glue: replicate listParams / extractParams (dict traversal, no compute)
# ----------------------------------------------------------------------------
def list_params(params, prefix=tuple(), multiplier=1):
    if "members" in params:
        multiplier *= len(params["members"])
    res = tuple()
    for key in params:
        if key == "members":
            continue
        if isinstance(params[key], dict):
            res += list_params(params[key], prefix=prefix + (key,), multiplier=multiplier)
        else:
            res += ((prefix + (key,), multiplier),)
    return res


def extract_params(robot_params, listed):
    tensor_items = []
    for item in listed:
        val = robot_params
        for key in item[0]:
            val = val[key]
        if not isinstance(val, list):
            val = [val]
        tensor_items += val
    return jnp.asarray(tensor_items, dtype=jnp.float32)  # (in_dim,)


# ----------------------------------------------------------------------------
# Pallas kernel: full MLP forward (LeakyReLU stack + fused mean/std head)
# ----------------------------------------------------------------------------
def _make_paramnet_kernel(num_hidden, stochastic, context_dim, max_dim):
    neg_slope = 0.01  # PyTorch LeakyReLU default

    def kernel(x_ref, w_ref, b_ref, o_ref):
        # x_ref: (B_PAD, max_dim) f32.  Real samples occupy the leading rows; padded rows
        # become bias-driven garbage after the first layer but are never read back.
        h = x_ref[...]

        # Hidden stack: y = x @ W + b ; LeakyReLU.  Static slices into the packed slabs.
        for l in range(num_hidden):
            w = w_ref[l * max_dim:(l + 1) * max_dim, :]        # (max_dim, max_dim) bf16
            b = b_ref[l * B_PAD:(l + 1) * B_PAD, :]            # (B_PAD, max_dim) f32, pre-replicated
            h = jnp.dot(h.astype(jnp.bfloat16), w,
                        preferred_element_type=jnp.float32) + b
            h = jnp.maximum(h, neg_slope * h)                  # LeakyReLU (0 < slope < 1)

        # Fused mean/std head: lanes [0, cd) = mean, [cd, 2cd) = std (pre-softplus).
        w = w_ref[num_hidden * max_dim:(num_hidden + 1) * max_dim, :]
        b = b_ref[num_hidden * B_PAD:(num_hidden + 1) * B_PAD, :]
        y = jnp.dot(h.astype(jnp.bfloat16), w, preferred_element_type=jnp.float32) + b

        lane = jax.lax.broadcasted_iota(jnp.int32, y.shape, dimension=1)
        std_mask = (lane >= context_dim) & (lane < 2 * context_dim)
        if stochastic:
            # F.softplus (beta=1, threshold=20); clamp the dead branch so exp() stays finite.
            sp = jnp.where(y > 20.0, y, jnp.log1p(jnp.exp(jnp.minimum(y, 20.0))))
            o_ref[...] = jnp.where(std_mask, sp, y)
        else:
            # context_std = zeros_like(...): write zeros directly, no dead softplus.
            o_ref[...] = jnp.where(std_mask, 0.0, y)

    return kernel


# ----------------------------------------------------------------------------
# ParamNet in JAX + Pallas
# ----------------------------------------------------------------------------
class ParamNetPallas:
    def __init__(self, network_params, robot_range, key, cache_extracted=True):
        self.listed = list_params(robot_range)
        self.in_dim = sum(item[1] for item in self.listed)
        self.context_dim = network_params["contextDim"]
        rp = network_params["robot_param"]
        self.fc_sizes = list(rp["fc_sizes"])
        self.fric_only = bool(rp.get("fric_only", False))
        self.stochastic = bool(rp.get("stochastic", False))
        if self.fric_only:
            assert self.in_dim >= 5, "fric_only slicing requires in_dim >= 5"

        # Host-side dict-walk cache.  Assumes a given robotParams dict is NOT mutated in
        # place between calls; pass cache_extracted=False for strict per-call re-extraction
        # parity with the PyTorch module.
        self._cache_extracted = cache_extracted
        self._extract_cache = {}

        # Padded feature dimension shared by all layers (multiple of 128 lanes).
        self.max_dim = LANE * pl.cdiv(
            max([self.in_dim, 2 * self.context_dim] + self.fc_sizes), LANE)
        md = self.max_dim

        # Deterministic parameter init (PyTorch-Linear-style uniform bounds), stored in f32.
        self.params = []  # list of (W(in,out), b(1,out))
        last_size = self.in_dim
        for size in self.fc_sizes:
            key, k = jax.random.split(key)
            self.params.append(self._init_linear(k, last_size, size))
            last_size = size
        key, k = jax.random.split(key)
        self.mean_head = self._init_linear(k, last_size, self.context_dim)
        key, k = jax.random.split(key)
        self.std_head = self._init_linear(k, last_size, self.context_dim)

        # ---- Pack weights into one lane-dense bf16 slab (halves the only real DMA). ----
        # Biases stay f32 and are pre-replicated across the 8 sublanes per layer so the
        # kernel does a plain static (8, max_dim) load (no per-layer sublane broadcast).
        head_w = jnp.concatenate([self.mean_head[0], self.std_head[0]], axis=1)
        head_b = jnp.concatenate([self.mean_head[1], self.std_head[1]], axis=1)
        layers = self.params + [(head_w, head_b)]
        self.num_layers = len(layers)

        w_slab = jnp.zeros((self.num_layers * md, md), jnp.float32)
        b_slab = jnp.zeros((self.num_layers * B_PAD, md), jnp.float32)
        for l, (w, b) in enumerate(layers):
            fi, fo = w.shape
            w_slab = w_slab.at[l * md:l * md + fi, :fo].set(w)
            b_slab = b_slab.at[l * B_PAD:(l + 1) * B_PAD, :fo].set(
                jnp.broadcast_to(b, (B_PAD, fo)))
        # TODO(synk): if fc_sizes ever grow (max_dim > ~512 or many layers), stream weights
        # with a per-layer grid + BlockSpec instead of one resident slab (v7x VMEM is 64 MiB).
        self._w_slab = jax.device_put(w_slab.astype(jnp.bfloat16))
        self._b_slab = jax.device_put(b_slab)

        kernel = _make_paramnet_kernel(
            num_hidden=len(self.params), stochastic=self.stochastic,
            context_dim=self.context_dim, max_dim=md)

        in_dim, cd, num_layers = self.in_dim, self.context_dim, self.num_layers
        fric_only = self.fric_only

        def core(x_batch, w_slab_, b_slab_):
            # x_batch: (B, in_dim) f32; B is static at trace time (jit caches per shape).
            bsz = x_batch.shape[0]
            nb = pl.cdiv(bsz, B_PAD)  # number of (8, max_dim) batch tiles
            if fric_only:
                # connected = ones_like(connected) * connected[..., -5:-4]  (tiny, pre-kernel)
                x_batch = jnp.broadcast_to(
                    x_batch[:, in_dim - 5:in_dim - 4], x_batch.shape)
            x = jnp.zeros((nb * B_PAD, md), jnp.float32)
            x = jax.lax.dynamic_update_slice(x, x_batch, (0, 0))
            out = pl.pallas_call(
                kernel,
                out_shape=jax.ShapeDtypeStruct((nb * B_PAD, md), jnp.float32),
                grid=(nb,),
                in_specs=[
                    pl.BlockSpec((B_PAD, md), lambda b: (b, 0)),              # activations
                    pl.BlockSpec((num_layers * md, md), lambda b: (0, 0)),    # bf16 W slab
                    pl.BlockSpec((num_layers * B_PAD, md), lambda b: (0, 0)), # f32 bias slab
                ],
                out_specs=pl.BlockSpec((B_PAD, md), lambda b: (b, 0)),
                compiler_params=pltpu.CompilerParams(
                    dimension_semantics=("parallel",)),
            )(x, w_slab_, b_slab_)
            # Lane-dense output slab: [0, cd) = mean, [cd, 2cd) = std.
            return out[:bsz, :cd], out[:bsz, cd:2 * cd]

        def fwd_single(x_vec, w_slab_, b_slab_):
            mean, std = core(x_vec[None, :], w_slab_, b_slab_)
            # .unsqueeze(0).unsqueeze(0)
            return mean.reshape(1, 1, cd), std.reshape(1, 1, cd)

        # Built/jitted once: repeated calls hit the compiled executables directly.
        self._fwd_single = jax.jit(fwd_single)
        self._fwd_batch = jax.jit(core)

    @staticmethod
    def _init_linear(key, fan_in, fan_out):
        k_w, k_b = jax.random.split(key)
        bound = 1.0 / math.sqrt(fan_in)
        w = jax.random.uniform(k_w, (fan_in, fan_out), jnp.float32, -bound, bound)
        b = jax.random.uniform(k_b, (1, fan_out), jnp.float32, -bound, bound)
        return w, b

    def _param_vector(self, robot_params):
        if self._cache_extracted:
            vec = self._extract_cache.get(id(robot_params))
            if vec is None:
                vec = extract_params(robot_params, self.listed)
                self._extract_cache[id(robot_params)] = vec
            return vec
        return extract_params(robot_params, self.listed)

    def __call__(self, robot_params):
        # Original single-sample semantics: returns (mean, std), each (1, 1, contextDim).
        x_vec = self._param_vector(robot_params)
        return self._fwd_single(x_vec, self._w_slab, self._b_slab)

    def forward_batch(self, x_batch):
        """Batched forward over pre-extracted parameter vectors of shape (B, in_dim)."""
        x_batch = jnp.asarray(x_batch, jnp.float32)
        return self._fwd_batch(x_batch, self._w_slab, self._b_slab)


# ----------------------------------------------------------------------------
# Pure-JAX reference (mirrors the kernel's bf16-weight MXU path) for correctness
# ----------------------------------------------------------------------------
def _bf16_dot(a, w):
    return jnp.dot(a.astype(jnp.bfloat16), w.astype(jnp.bfloat16),
                   preferred_element_type=jnp.float32)


def reference_forward(net: ParamNetPallas, x_batch):
    h = jnp.asarray(x_batch, jnp.float32)
    if net.fric_only:
        h = jnp.broadcast_to(h[:, net.in_dim - 5:net.in_dim - 4], h.shape)
    for w, b in net.params:
        h = _bf16_dot(h, w) + b
        h = jnp.maximum(h, 0.01 * h)
    mean = _bf16_dot(h, net.mean_head[0]) + net.mean_head[1]
    s = _bf16_dot(h, net.std_head[0]) + net.std_head[1]
    if net.stochastic:
        std = jnp.where(s > 20.0, s, jnp.log1p(jnp.exp(jnp.minimum(s, 20.0))))
    else:
        std = jnp.zeros_like(s)
    return mean, std


if __name__ == "__main__":
    key = jax.random.PRNGKey(0)

    # Synthetic robot parameter range / instance (multipliers match list lengths).
    robot_range = {
        "legs": {
            "members": ["fl", "fr", "bl", "br"],
            "friction": [0.8, 0.9, 0.7, 0.85],
            "damping": [0.1, 0.2, 0.1, 0.2],
        },
        "mass": 5.0,
        "com": {"x": 0.0, "y": 0.1, "z": 0.2},
    }  # -> in_dim = 4 + 4 + 1 + 1 + 1 + 1 = 12

    network_params = {
        "contextDim": 8,
        "robot_param": {"fc_sizes": [32, 16], "stochastic": True, "fric_only": False},
    }
    cd = network_params["contextDim"]

    key, net_key = jax.random.split(key)
    net = ParamNetPallas(network_params, robot_range, net_key)

    # Single-sample path (matches the PyTorch forward); the second call reuses both the
    # cached extracted vector and the compiled executable.
    mean, std = net(robot_range)
    mean, std = net(robot_range)
    mean, std = jax.block_until_ready((mean, std))

    x_vec = extract_params(robot_range, net.listed)
    ref_mean, ref_std = reference_forward(net, x_vec[None, :])
    assert mean.shape == (1, 1, cd) and std.shape == (1, 1, cd)
    assert jnp.allclose(mean[0, 0], ref_mean[0], atol=1e-4, rtol=1e-4)
    assert jnp.allclose(std[0, 0], ref_std[0], atol=1e-4, rtol=1e-4)

    # Batched path: 5 samples packed into the sublane rows of one (8, max_dim) tile.
    key, bkey = jax.random.split(key)
    xb = jax.random.uniform(bkey, (5, net.in_dim), jnp.float32, 0.1, 1.0)
    bmean, bstd = jax.block_until_ready(net.forward_batch(xb))
    rmean, rstd = reference_forward(net, xb)
    assert bmean.shape == (5, cd) and bstd.shape == (5, cd)
    assert jnp.allclose(bmean, rmean, atol=1e-4, rtol=1e-4)
    assert jnp.allclose(bstd, rstd, atol=1e-4, rtol=1e-4)

    # Second config exercises the fric_only / non-stochastic branches.
    network_params2 = {
        "contextDim": 8,
        "robot_param": {"fc_sizes": [32, 16], "stochastic": False, "fric_only": True},
    }
    net2 = ParamNetPallas(network_params2, robot_range, jax.random.PRNGKey(1))
    mean2, std2 = jax.block_until_ready(net2(robot_range))
    ref_mean2, ref_std2 = reference_forward(net2, x_vec[None, :])
    assert mean2.shape == (1, 1, cd) and std2.shape == (1, 1, cd)
    assert jnp.allclose(mean2[0, 0], ref_mean2[0], atol=1e-4, rtol=1e-4)
    assert jnp.allclose(std2, 0.0) and jnp.allclose(ref_std2, 0.0)

    print("KERNEL_OK")
</pallas_src>

<mosaic_0001>
module attributes {stable_mosaic.version = 11 : i64} {
  func.func @kernel(%arg0: i32, %arg1: memref<8x128xf32, #tpu.memory_space<vmem>>, %arg2: memref<384x128xbf16, #tpu.memory_space<vmem>>, %arg3: memref<24x128xf32, #tpu.memory_space<vmem>>, %arg4: memref<8x128xf32, #tpu.memory_space<vmem>>) attributes {dimension_semantics = [#tpu.dimension_semantics<parallel>], iteration_bounds = array<i64: 1>, scalar_prefetch = 0 : i64, scratch_operands = 0 : i64, tpu.core_type = #tpu.core_type<tc>, window_params = [{transform_indices = @transform_0, window_bounds = array<i64: 8, 128>}, {pipeline_mode = #tpu.pipeline_mode<synchronous>, transform_indices = @transform_1, window_bounds = array<i64: 384, 128>}, {pipeline_mode = #tpu.pipeline_mode<synchronous>, transform_indices = @transform_2, window_bounds = array<i64: 24, 128>}, {transform_indices = @transform_3, window_bounds = array<i64: 8, 128>}]} {
    %c0 = arith.constant 0 : index
    %c0_0 = arith.constant 0 : index
    %0 = vector.load %arg1[%c0, %c0_0] : memref<8x128xf32, #tpu.memory_space<vmem>>, vector<8x128xf32>
    %c0_1 = arith.constant 0 : index
    %c0_2 = arith.constant 0 : index
    %1 = vector.load %arg2[%c0_1, %c0_2] : memref<384x128xbf16, #tpu.memory_space<vmem>>, vector<128x128xbf16>
    %c0_3 = arith.constant 0 : index
    %c0_4 = arith.constant 0 : index
    %2 = vector.load %arg3[%c0_3, %c0_4] : memref<24x128xf32, #tpu.memory_space<vmem>>, vector<8x128xf32>
    %3 = arith.truncf %0 : vector<8x128xf32> to vector<8x128xbf16>
    %cst = arith.constant dense<0.000000e+00> : vector<8x128xf32>
    %4 = tpu.matmul %3, %1, %cst {dimension_numbers = #tpu.dot_dimension_numbers<[1], [0], [0], [1], [0, 0, 1, 1], [], []>} : vector<8x128xbf16>, vector<128x128xbf16>, vector<8x128xf32> -> vector<8x128xf32>
    %5 = arith.addf %4, %2 : vector<8x128xf32>
    %cst_5 = arith.constant 0.00999999977 : f32
    %6 = vector.broadcast %cst_5 : f32 to vector<8x128xf32>
    %7 = arith.mulf %6, %5 : vector<8x128xf32>
    %8 = arith.maximumf %5, %7 : vector<8x128xf32>
    %c128 = arith.constant 128 : index
    %c0_6 = arith.constant 0 : index
    %9 = vector.load %arg2[%c128, %c0_6] : memref<384x128xbf16, #tpu.memory_space<vmem>>, vector<128x128xbf16>
    %c8 = arith.constant 8 : index
    %c0_7 = arith.constant 0 : index
    %10 = vector.load %arg3[%c8, %c0_7] : memref<24x128xf32, #tpu.memory_space<vmem>>, vector<8x128xf32>
    %11 = arith.truncf %8 : vector<8x128xf32> to vector<8x128xbf16>
    %cst_8 = arith.constant dense<0.000000e+00> : vector<8x128xf32>
    %12 = tpu.matmul %11, %9, %cst_8 {dimension_numbers = #tpu.dot_dimension_numbers<[1], [0], [0], [1], [0, 0, 1, 1], [], []>} : vector<8x128xbf16>, vector<128x128xbf16>, vector<8x128xf32> -> vector<8x128xf32>
    %13 = arith.addf %12, %10 : vector<8x128xf32>
    %cst_9 = arith.constant 0.00999999977 : f32
    %14 = vector.broadcast %cst_9 : f32 to vector<8x128xf32>
    %15 = arith.mulf %14, %13 : vector<8x128xf32>
    %16 = arith.maximumf %13, %15 : vector<8x128xf32>
    %c256 = arith.constant 256 : index
    %c0_10 = arith.constant 0 : index
    %17 = vector.load %arg2[%c256, %c0_10] : memref<384x128xbf16, #tpu.memory_space<vmem>>, vector<128x128xbf16>
    %c16 = arith.constant 16 : index
    %c0_11 = arith.constant 0 : index
    %18 = vector.load %arg3[%c16, %c0_11] : memref<24x128xf32, #tpu.memory_space<vmem>>, vector<8x128xf32>
    %19 = arith.truncf %16 : vector<8x128xf32> to vector<8x128xbf16>
    %cst_12 = arith.constant dense<0.000000e+00> : vector<8x128xf32>
    %20 = tpu.matmul %19, %17, %cst_12 {dimension_numbers = #tpu.dot_dimension_numbers<[1], [0], [0], [1], [0, 0, 1, 1], [], []>} : vector<8x128xbf16>, vector<128x128xbf16>, vector<8x128xf32> -> vector<8x128xf32>
    %21 = arith.addf %20, %18 : vector<8x128xf32>
    %22 = tpu.iota {dimensions = array<i32: 1>} : vector<8x128xi32>
    %c8_i32 = arith.constant 8 : i32
    %23 = vector.broadcast %c8_i32 : i32 to vector<8x128xi32>
    %24 = arith.cmpi sge, %22, %23 : vector<8x128xi32>
    %c16_i32 = arith.constant 16 : i32
    %25 = vector.broadcast %c16_i32 : i32 to vector<8x128xi32>
    %26 = arith.cmpi slt, %22, %25 : vector<8x128xi32>
    %27 = arith.andi %24, %26 : vector<8x128xi1>
    %cst_13 = arith.constant 2.000000e+01 : f32
    %28 = vector.broadcast %cst_13 : f32 to vector<8x128xf32>
    %29 = arith.cmpf ogt, %21, %28 : vector<8x128xf32>
    %cst_14 = arith.constant 2.000000e+01 : f32
    %30 = vector.broadcast %cst_14 : f32 to vector<8x128xf32>
    %31 = arith.minimumf %21, %30 : vector<8x128xf32>
    %32 = math.exp %31 : vector<8x128xf32>
    %33 = math.log1p %32 : vector<8x128xf32>
    %34 = arith.select %29, %21, %33 : vector<8x128xi1>, vector<8x128xf32>
    %35 = arith.select %27, %34, %21 : vector<8x128xi1>, vector<8x128xf32>
    %c0_15 = arith.constant 0 : index
    %c0_16 = arith.constant 0 : index
    %36 = vector.load %arg4[%c0_15, %c0_16] : memref<8x128xf32, #tpu.memory_space<vmem>>, vector<8x128xf32>
    tpu.vector_store %arg4[%c0_15, %c0_16], %35 {strides = array<i32>} : memref<8x128xf32, #tpu.memory_space<vmem>>, vector<8x128xf32>,
    return
  }
  func.func @transform_0(%arg0: i32) -> (i32, i32) {
    %c0_i32 = arith.constant 0 : i32
    %c0_i32_0 = arith.constant 0 : i32
    return %arg0, %c0_i32 : i32, i32
  }
  func.func @transform_1(%arg0: i32) -> (i32, i32) {
    %c0_i32 = arith.constant 0 : i32
    %c0_i32_0 = arith.constant 0 : i32
    %c0_i32_1 = arith.constant 0 : i32
    return %c0_i32, %c0_i32_0 : i32, i32
  }
  func.func @transform_2(%arg0: i32) -> (i32, i32) {
    %c0_i32 = arith.constant 0 : i32
    %c0_i32_0 = arith.constant 0 : i32
    %c0_i32_1 = arith.constant 0 : i32
    return %c0_i32, %c0_i32_0 : i32, i32
  }
  func.func @transform_3(%arg0: i32) -> (i32, i32) {
    %c0_i32 = arith.constant 0 : i32
    %c0_i32_0 = arith.constant 0 : i32
    return %arg0, %c0_i32 : i32, i32
  }
}

</mosaic_0001>

<bundles_post_ra>
// kernel: fwd_single.1
= control target key start
LH: loop header
LB: loop body
LE: loop exit
PB: predicated region body
PF: predicated region fallthrough
CT: control target
= control target key end

     0   :  { %8 = vsyncpa [#allocation3], 0  ;;  %s676_s0 = inlined_call_operand.vmem [shape: f32[8,128], index: 0, kind: input, shape index: {}]   ;;  %s677_s1 = inlined_call_operand.hbm [shape: bf16[384,128], index: 1, kind: input, shape index: {}]   ;;  %s678_s2 = inlined_call_operand.hbm [shape: f32[24,128], index: 2, kind: input, shape index: {}]   ;;  %s679_s3 = inlined_call_operand.vmem [shape: f32[8,128], index: 3, kind: output, shape index: {}]  }
   0x1   :  { %9 = vsyncpa [#allocation5], 0  ;;  %s588_s12 = smov [#allocation2]   ;;  %s540_s16 = scalar_lea.hbm %s677_s1, 3072 }
   0x2   :  { %s17_s13 = sshll.u32 %s588_s12, 4  ;;  %p541_p0 = scmp.ne.s32.totalorder %s677_s1, %s540_s16  ;;  %s18_s13 = int_to_ptr.vmem [resolvable:$true] %s17_s13 }
   0x3   :  { %p544_p1 = scmp.lt.u32.totalorder %s540_s16, %s677_s1 }
   0x5   :  { %p546_p2 = pnand %p544_p1, %p541_p0 }
   0x7   :  { %549 = shalt.err (!%p546_p2)
}
   0x8   :  { %s550_s21 = scalar_lea.vmem %s18_s13, 3072  ;;  %p555_p4 = scmp.lt.s32.totalorder %s18_s13, %s18_s13 }
   0x9   :  { %p551_p3 = scmp.ne.s32.totalorder %s18_s13, %s550_s21  ;;  %p556_p5 = scmp.lt.s32.totalorder %s550_s21, %s550_s21 }
   0xb   :  { %p557_p6 = por %p556_p5, %p555_p4 }
   0xd   :  { %p558_p7 = pnand %p557_p6, %p551_p3 }
   0xf   :  { %561 = shalt.err (!%p558_p7)
}
  0x10   :  { %s589_s22 = smov 64   ;;  %s590_s23 = smov 4  }
  0x11   :  { %23 = dma.hbm_to_vmem [thread:$0]  %s677_s1, 3072, %s18_s13, [#allocation3], %s589_s22, %s589_s22, %s590_s23  }
  0x12   :  { %s591_s26 = smov [#allocation4]   ;;  %s562_s30 = scalar_lea.hbm %s678_s2, 384 }
  0x13   :  { %s29_s27 = sshll.u32 %s591_s26, 4  ;;  %p563_p8 = scmp.ne.s32.totalorder %s678_s2, %s562_s30  ;;  %s30_s27 = int_to_ptr.vmem [resolvable:$true] %s29_s27 }
  0x14   :  { %p566_p9 = scmp.lt.u32.totalorder %s562_s30, %s678_s2 }
  0x16   :  { %p568_p10 = pnand %p566_p9, %p563_p8 }
  0x18   :  { %571 = shalt.err (!%p568_p10)
}
  0x19   :  { %s572_s8 = scalar_lea.vmem %s30_s27, 384  ;;  %p577_p12 = scmp.lt.s32.totalorder %s30_s27, %s30_s27 }
  0x1a   :  { %p573_p11 = scmp.ne.s32.totalorder %s30_s27, %s572_s8  ;;  %p578_p13 = scmp.lt.s32.totalorder %s572_s8, %s572_s8 }
  0x1c   :  { %p579_p0 = por %p578_p13, %p577_p12 }
  0x1e   :  { %p580_p1 = pnand %p579_p0, %p573_p11 }
  0x20   :  { %583 = shalt.err (!%p580_p1)
}
  0x21   :  { %s592_s1 = smov 128   ;;  %s593_s9 = smov 8  }
  0x22   :  { %35 = dma.hbm_to_vmem [thread:$0]  %s678_s2, 384, %s30_s27, [#allocation5], %s592_s1, %s592_s1, %s593_s9  }
  0x23   :  { %584 = dma.done.wait [#allocation3], 3072  }
  0x24   :  { %585 = vsyncadd [#allocation3], 4294964224 }
  0x25   :  { %586 = dma.done.wait [#allocation5], 384  }
  0x26   :  { %587 = vsyncadd [#allocation5], 4294966912  ;;  %v594_v0 = vmov 0.0   ;;  %vm595_vm0 = vmmov 0   ;;  %v512_v1 = vld [vmem:[#allocation2] sm:$0xff]   ;;  %v513_v2 = vld [vmem:[#allocation2 + $0x8] sm:$0xff]   ;;  %v366_v55 = vlaneseq }
  0x27   :  { %444 = vmatprep.subr.bf16.mxu0 %v594_v0  ;;  %460 = vmatprep.mubr.msk.bf16.mxu0 %vm595_vm0, %v594_v0  ;;  %v514_v3 = vld [vmem:[#allocation2 + $0x10] sm:$0xff]   ;;  %v520_v4 = vld [vmem:[#allocation2 + $0x40] sm:$0xff]   ;;  %v515_v5 = vld [vmem:[#allocation2 + $0x18] sm:$0xff]  }
  0x28   :  { %464 = vmatprep.subr.bf16.mxu1 %v594_v0  ;;  %480 = vmatprep.mubr.msk.bf16.mxu1 %vm595_vm0, %v594_v0  ;;  %v521_v6 = vld [vmem:[#allocation2 + $0x48] sm:$0xff]   ;;  %v516_v7 = vld [vmem:[#allocation2 + $0x20] sm:$0xff]   ;;  %v522_v8 = vld [vmem:[#allocation2 + $0x50] sm:$0xff]   ;;  %v367_v57 = vand.u32 127, %v366_v55 }
  0x29   :  { %445 = vmatpush3.bf16.msra.mxu0 %v512_v1  ;;  %465 = vmatpush3.bf16.msra.mxu1 %v520_v4  ;;  %v517_v9 = vld [vmem:[#allocation2 + $0x28] sm:$0xff]   ;;  %v523_v10 = vld [vmem:[#allocation2 + $0x58] sm:$0xff]   ;;  %v518_v11 = vld [vmem:[#allocation2 + $0x30] sm:$0xff]  }
  0x2a   :  { %446 = vmatprep.subr.bf16.mxu0 %v594_v0  ;;  %466 = vmatprep.subr.bf16.mxu1 %v594_v0  ;;  %v524_v12 = vld [vmem:[#allocation2 + $0x60] sm:$0xff]   ;;  %v519_v13 = vld [vmem:[#allocation2 + $0x38] sm:$0xff]   ;;  %v525_v15 = vld [vmem:[#allocation2 + $0x68] sm:$0xff]   ;;  %vm368_vm1 = vcmp.ge.s32.totalorder %v367_v57, 8  ;;  %vm369_vm2 = vcmp.lt.s32.totalorder %v367_v57, 16 }
  0x2b   :  { %v43_v14 = vld [vmem:[%s676_s0] sm:$0xff]  ;;  %v526_v17 = vld [vmem:[#allocation2 + $0x70] sm:$0xff]   ;;  %v527_v18 = vld [vmem:[#allocation2 + $0x78] sm:$0xff]  }
  0x2c   :  { %v61_v16 = vpack.c.bf16 %v43_v14, %v43_v14  ;;  %v528_v19 = vld [vmem:[#allocation2 + $0x80] sm:$0xff]   ;;  %v529_v20 = vld [vmem:[#allocation2 + $0x88] sm:$0xff]   ;;  %v530_v21 = vld [vmem:[#allocation2 + $0x90] sm:$0xff]  }
  0x2d   :  { %447 = vmatpush3.bf16.msra.mxu0 %v513_v2  ;;  %467 = vmatpush3.bf16.msra.mxu1 %v521_v6  ;;  %v531_v22 = vld [vmem:[#allocation2 + $0x98] sm:$0xff]   ;;  %v532_v23 = vld [vmem:[#allocation2 + $0xa0] sm:$0xff]   ;;  %v533_v24 = vld [vmem:[#allocation2 + $0xa8] sm:$0xff]  }
  0x2e   :  { %448 = vmatprep.subr.bf16.mxu0 %v594_v0  ;;  %468 = vmatprep.subr.bf16.mxu1 %v594_v0  ;;  %v60_v25 = vld [vmem:[#allocation4] sm:$0xff]  ;;  %v534_v34 = vld [vmem:[#allocation2 + $0xb0] sm:$0xff]   ;;  %v535_v35 = vld [vmem:[#allocation2 + $0xb8] sm:$0xff]  }
  0x2f   :  { %v168_v36 = vld [vmem:[#allocation4 + $0x8] sm:$0xff]  ;;  %v276_v45 = vld [vmem:[#allocation4 + $0x10] sm:$0xff]  ;;  %vm370_vm3 = vmand %vm368_vm1, %vm369_vm2 }
  0x31   :  { %449 = vmatpush3.bf16.msra.mxu0 %v514_v3  ;;  %469 = vmatpush3.bf16.msra.mxu1 %v522_v8 }
  0x32   :  { %450 = vmatprep.subr.bf16.mxu0 %v594_v0  ;;  %470 = vmatprep.subr.bf16.mxu1 %v594_v0 }
  0x35   :  { %451 = vmatpush3.bf16.msra.mxu0 %v515_v5  ;;  %471 = vmatpush3.bf16.msra.mxu1 %v523_v10 }
  0x36   :  { %452 = vmatprep.subr.bf16.mxu0 %v594_v0  ;;  %472 = vmatprep.subr.bf16.mxu1 %v594_v0 }
  0x39   :  { %453 = vmatpush3.bf16.msra.mxu0 %v516_v7  ;;  %473 = vmatpush3.bf16.msra.mxu1 %v524_v12 }
  0x3a   :  { %454 = vmatprep.subr.bf16.mxu0 %v594_v0  ;;  %474 = vmatprep.subr.bf16.mxu1 %v594_v0 }
  0x3d   :  { %455 = vmatpush3.bf16.msra.mxu0 %v517_v9  ;;  %475 = vmatpush3.bf16.msra.mxu1 %v525_v15 }
  0x3e   :  { %456 = vmatprep.subr.bf16.mxu0 %v594_v0  ;;  %476 = vmatprep.subr.bf16.mxu1 %v594_v0 }
  0x41   :  { %457 = vmatpush3.bf16.msra.mxu0 %v518_v11  ;;  %477 = vmatpush3.bf16.msra.mxu1 %v526_v17 }
  0x42   :  { %458 = vmatprep.subr.bf16.mxu0 %v594_v0  ;;  %478 = vmatprep.subr.bf16.mxu1 %v594_v0 }
  0x45   :  { %459 = vmatpush3.bf16.msra.mxu0 %v519_v13  ;;  %479 = vmatpush3.bf16.msra.mxu1 %v527_v18 }
  0x46   :  { %484 = vmatprep.subr.bf16.mxu0 %v594_v0 }
  0x48   :  { %461 = vmatmul.mubr.bf16.vlgmr.msra.gmra.mrb[0].mxu0 %v61_v16 }
  0x49   :  { %500 = vmatprep.mubr.msk.bf16.mxu0 %vm595_vm0, %v594_v0  ;;  %485 = vmatpush3.bf16.msra.mxu0 %v528_v19 }
  0x4a   :  { %486 = vmatprep.subr.bf16.mxu0 %v594_v0 }
  0x4d   :  { %487 = vmatpush3.bf16.msra.mxu0 %v529_v20 }
  0x4e   :  { %488 = vmatprep.subr.bf16.mxu0 %v594_v0 }
  0x51   :  { %489 = vmatpush3.bf16.msra.mxu0 %v530_v21 }
  0x52   :  { %490 = vmatprep.subr.bf16.mxu0 %v594_v0 }
  0x55   :  { %491 = vmatpush3.bf16.msra.mxu0 %v531_v22 }
  0x56   :  { %492 = vmatprep.subr.bf16.mxu0 %v594_v0 }
  0x59   :  { %493 = vmatpush3.bf16.msra.mxu0 %v532_v23 }
  0x5a   :  { %494 = vmatprep.subr.bf16.mxu0 %v594_v0 }
  0x5d   :  { %495 = vmatpush3.bf16.msra.mxu0 %v533_v24 }
  0x5e   :  { %496 = vmatprep.subr.bf16.mxu0 %v594_v0 }
  0x61   :  { %497 = vmatpush3.bf16.msra.mxu0 %v534_v34 }
  0x62   :  { %498 = vmatprep.subr.bf16.mxu0 %v594_v0 }
  0x65   :  { %499 = vmatpush3.bf16.msra.mxu0 %v535_v35 }
 0x11b   :  { %v144_v26 = vpop.f32.mrb[0].mxu0 }
 0x11c   :  { %v145_v27 = vadd.f32 %v144_v26, %v60_v25  ;;  %v462_v28 = vpop.f32.mrb[1].mxu0 }
 0x11d   :  { %v147_v29 = vpop.f32.mrb[2].mxu0 }
 0x11e   :  { %v150_v30 = vmul.f32 0.01, %v145_v27  ;;  %v463_v31 = vpop.f32.mrb[3].mxu0 }
 0x120   :  { %v151_v32 = vmax.f32 %v145_v27, %v150_v30 }
 0x122   :  { %v169_v33 = vpack.c.bf16 %v151_v32, %v151_v32 }
 0x124   :  { %481 = vmatmul.mubr.bf16.vlgmr.msra.gmra.mrb[0].mxu1 %v169_v33 }
 0x1f7   :  { %v252_v37 = vpop.f32.mrb[0].mxu1 }
 0x1f8   :  { %v253_v38 = vadd.f32 %v252_v37, %v168_v36  ;;  %v482_v39 = vpop.f32.mrb[1].mxu1 }
 0x1f9   :  { %v255_v40 = vpop.f32.mrb[2].mxu1 }
 0x1fa   :  { %v258_v41 = vmul.f32 0.01, %v253_v38  ;;  %v483_v42 = vpop.f32.mrb[3].mxu1 }
 0x1fc   :  { %v259_v43 = vmax.f32 %v253_v38, %v258_v41 }
 0x1fe   :  { %v277_v44 = vpack.c.bf16 %v259_v43, %v259_v43 }
 0x200   :  { %501 = vmatmul.mubr.bf16.vlgmr.msra.gmra.mrb[4].mxu0 %v277_v44 }
 0x2d3   :  { %v360_v46 = vpop.f32.mrb[4].mxu0 }
 0x2d4   :  { %v361_v47 = vadd.f32 %v360_v46, %v276_v45  ;;  %v502_v48 = vpop.f32.mrb[5].mxu0 }
 0x2d5   :  { %v363_v49 = vpop.f32.mrb[6].mxu0 }
 0x2d6   :  { %v372_v50 = vmin.f32 %v361_v47, 20.0  ;;  %v503_v51 = vpop.f32.mrb[7].mxu0  ;;  %vm371_vm5 = vcmp.gt.f32.partialorder %v361_v47, 20.0 }
 0x2d8   :  { %v373_v52 = vmul.f32 1.442695, %v372_v50 }
 0x2da   :  { %536 = vpow2.f32 %v373_v52 }
 0x2e4   :  { %v537_v53 = vpop.eup %536 }
 0x2e5   :  { %v375_v54 = vadd.f32 1.0, %v537_v53  ;;  %v378_v56 = vmul.f32 -0.5, %v537_v53  ;;  %v381_v59 = vand.u32 2147483647, %v537_v53 }
 0x2e7   :  { %538 = vlog2.f32 %v375_v54  ;;  %v379_v58 = vadd.f32 1.0, %v378_v56  ;;  %vm382_vm4 = vcmp.lt.f32.partialorder %v381_v59, 0.0004427343 }
 0x2e9   :  { %v380_v62 = vmul.f32 %v537_v53, %v379_v58 }
 0x2f1   :  { %v539_v60 = vpop.eup %538 }
 0x2f2   :  { %v377_v61 = vmul.f32 0.6931472, %v539_v60 }
 0x2f4   :  { %v383_v63 = vsel %vm382_vm4, %v380_v62, %v377_v61 }
 0x2f5   :  { %v384_v0 = vsel %vm371_vm5, %v361_v47, %v383_v63 }
 0x2f6   :  { %v385_v1 = vsel %vm370_vm3, %v384_v0, %v361_v47 }
 0x2f7   :  { %386 = vst [vmem:[%s679_s3] sm:$0xff] %v385_v1 }
 0x2f8   :  { %391 = vsyncpa [#allocation3], 1 }
 0x2f9   :  { %392 = vsyncpa [#allocation5], 1 }

</bundles_post_ra>
